<compile_context>
chip_gen: v5e
topology: v5e:2x2
jax: 0.10.0
libtpu: 0.0.40
codegen_flags: <defaults>
</compile_context>

<pallas_src>
import functools

import jax
import jax.numpy as jnp
import numpy as np
from jax.experimental import pallas as pl
from jax.experimental.pallas import tpu as pltpu

_LANE = 128                      # lane width; last dim of every kernel tile
assert _LANE % 4 == 0, "lane width must hold whole (x, y, w, h) groups"


def _round_up(x, m):
    return ((x + m - 1) // m) * m


def _cdiv(a, b):
    return -(-a // b)


def _chip_budget():
    """Returns (deltas-row tile cap, vmem_limit_bytes or None) per TPU generation."""
    try:
        kind = jax.devices()[0].device_kind.lower()
    except Exception:  # pragma: no cover - defensive
        kind = ""
    if "v5 lite" in kind or "v5e" in kind:
        # 16 MiB scoped-VMEM default, ~0.8 TB/s HBM: 1 MiB tiles already amortize well.
        return 2048, None
    if "v6" in kind:
        # 128 MiB physical VMEM: big lane-dense tiles amortize the ~0.35 us/step cost.
        return 8192, 96 * 1024 * 1024
    if "v7" in kind:
        # 64 MiB physical VMEM per TC, 2 TCs/chip: 2 MiB tiles + scratch headroom.
        return 4096, 48 * 1024 * 1024
    # Unknown generation: conservative defaults (always fit the scoped default).
    return 2048, None


def _pick_tiles(rows_d, rows_l, row_cap, vmem_limit):
    """Pick (grid_steps, deltas_row_tile, logits_row_tile) along the anchor axis.

    Shrinks the tile until the double-buffered f32 working set
    (deltas + anchors + boxes tiles of `trd` rows, logits + scores tiles of
    `trl` rows) fits the VMEM budget.
    """
    budget = vmem_limit if vmem_limit else 12 * 1024 * 1024
    cap = max(8, row_cap)
    while True:
        if rows_d <= cap:
            # Single full-dim block per batch: always a legal block shape.
            g, trd, trl = 1, rows_d, rows_l
        else:
            trd = cap                                   # multiple of 8
            g = _cdiv(rows_d, trd)
            trl = min(_round_up(_cdiv(rows_l, g), 8), rows_l)
        working = 2 * (_LANE * 4) * (3 * trd + 2 * trl)  # double-buffered f32 tiles
        if working <= budget or cap <= 8:
            return g, trd, trl
        cap = max(8, _round_up(cap // 2, 8))


# --------------------------------------------------------------------------
# Anchor generation (static config; mirrors BBoxPrior.generate_* semantics)
# --------------------------------------------------------------------------
def generate_base_anchors(anchor_layouts):
    strides, layouts = [], []
    for item in anchor_layouts:
        stride = item["stride"]
        scales = jnp.asarray(item["scales"], jnp.float32) * stride
        aspects = jnp.asarray(item["aspects"], jnp.float32)
        sizes = scales[:, None] * jnp.ones((1, 2), jnp.float32)               # (S, 2)
        ratios = jnp.stack([jnp.sqrt(aspects), 1.0 / jnp.sqrt(aspects)], -1)  # (A, 2)
        sizes = (ratios[None, :, :] * sizes[:, None, :]).reshape(-1, 2)       # (S*A, 2)
        centers = jnp.zeros_like(sizes)
        bases = jnp.concatenate([centers, sizes], axis=-1)                    # (S*A, 4)
        strides.append(stride)
        layouts.append(bases)
    return strides, layouts


def generate_layer_anchors(stride, fsize, layout):
    fw, fh = fsize
    vx = (jnp.arange(fw, dtype=jnp.float32) + 0.5) * stride
    vy = (jnp.arange(fh, dtype=jnp.float32) + 0.5) * stride
    vy_g, vx_g = jnp.meshgrid(vy, vx, indexing="ij")            # (fh, fw)
    offsets = jnp.stack([vx_g, vy_g], axis=-1)                  # (fh, fw, 2)
    a = layout.shape[0]
    anchors = jnp.broadcast_to(layout[None, None], (fh, fw, a, 4))
    anchors = anchors.at[:, :, :, :2].add(offsets[:, :, None, :])
    return anchors.reshape(-1, 4)                               # (fh*fw*A, 4) cbox


def generate_anchors(strides, fsizes, layouts):
    per_layer = [
        generate_layer_anchors(s, f, l) for s, f, l in zip(strides, fsizes, layouts)
    ]
    return jnp.concatenate(per_layer, axis=0)                   # (N, 4)


def prepare_anchor_plane(strides, fsizes, layouts):
    """Build the interleaved (rowsD, 128) anchor plane ONCE, outside the jitted
    forward (anchors are static for fixed feature sizes)."""
    anchors = generate_anchors(strides, fsizes, layouts)        # (N, 4)
    tot = anchors.shape[0] * 4
    pad = _round_up(tot, _LANE) - tot
    assert pad % 4 == 0                                         # keeps lane % 4 alignment
    flat = anchors.reshape(-1)
    if pad:
        flat = jnp.pad(flat, (0, pad))
    return flat.reshape(-1, _LANE)                              # (rowsD, 128)


# --------------------------------------------------------------------------
# Fused kernel: sigmoid(logits) + bbox delta decode, one grid over the anchor
# axis (rows of fully lane/sublane-dense (rows, 128) views) x batch.
# --------------------------------------------------------------------------
def _lane_pattern(coord, vals):
    """Per-lane (1, 128) constant repeating vals[0..3] with period 4 (coord = lane % 4)."""
    vals = tuple(float(v) for v in vals)
    if vals[0] == vals[1] and vals[2] == vals[3]:
        if vals[0] == vals[2]:
            return jnp.float32(vals[0])
        return jnp.where(coord < 2, jnp.float32(vals[0]), jnp.float32(vals[2]))
    out = jnp.full(coord.shape, vals[3], jnp.float32)
    for c in (2, 1, 0):
        out = jnp.where(coord == c, jnp.float32(vals[c]), out)
    return out


def _make_fused_kernel(encode_mean, encode_std):
    mean = tuple(float(v) for v in encode_mean)
    std = tuple(float(v) for v in encode_std)

    def kernel(logits_ref, deltas_ref, anchors_ref, scores_ref, boxes_ref):
        # ---- score path: elementwise sigmoid over a fully dense tile --------
        x = logits_ref[0]
        scores_ref[0] = 1.0 / (1.0 + jnp.exp(-x))   # exact; f32 overflow saturates fine

        # ---- box decode on the interleaved (dx,dy,dw,dh) lane layout --------
        # deltas_ref:  (1, TRD, 128) interleaved (dx, dy, dw, dh) per anchor
        # anchors_ref: (TRD, 128)    interleaved (cx, cy,  w,  h) per anchor
        d = deltas_ref[0]
        anc = anchors_ref[...]
        lane = d.shape[-1]

        # Lane-only coordinate pattern (coord = lane % 4): a (1, 128) constant
        # broadcast over sublanes — no full-tile integer iota per grid step.
        coord = jax.lax.broadcasted_iota(jnp.int32, (1, lane), 1) & 3
        is_xy = coord < 2

        # encode_mean / encode_std are compile-time constants.
        if any(v != 1.0 for v in std):
            d = d * _lane_pattern(coord, std)
        if any(v != 0.0 for v in mean):
            d = d + _lane_pattern(coord, mean)

        # roll(x, lane-2) brings x[i+2] to lane i (only consumed at coord 0/1,
        # so per-row wraparound lanes are never read).  XLU slot, ~free here.
        anc_wh_at_xy = pltpu.roll(anc, shift=lane - 2, axis=1)
        ctr = d * anc_wh_at_xy + anc                 # decoded centers at coord 0,1
        # exp(d) is also evaluated on x/y lanes where it is never consumed; any
        # inf produced there is discarded by the final select (benign).
        size = jnp.exp(d) * anc                      # decoded sizes   at coord 2,3
        size_at_xy = pltpu.roll(size, shift=lane - 2, axis=1)   # w,h   -> coord 0,1
        ctr_at_wh = pltpu.roll(ctr, shift=2, axis=1)            # cx,cy -> coord 2,3

        x1y1 = ctr - 0.5 * size_at_xy                # valid at coord 0,1
        x2y2 = ctr_at_wh + 0.5 * size                # valid at coord 2,3
        boxes_ref[0] = jnp.where(is_xy, x1y1, x2y2)

    return kernel


def sigmoid_decode_pallas(logits, pred_deltas, anchors2d, *, encode_mean, encode_std):
    """logits: (B, N, C); pred_deltas: (B, N, 4); anchors2d: (rowsD, 128) cbox plane.
    Returns (scores (B, N, C), boxes (B, N, 4) as x1,y1,x2,y2)."""
    B, N, C = logits.shape
    tot_l = N * C
    tot_d = N * 4

    pad_l = _round_up(tot_l, _LANE) - tot_l
    pad_d = _round_up(tot_d, _LANE) - tot_d
    assert pad_d % 4 == 0                    # anchor (x,y,w,h) groups stay lane-aligned

    # Free (bitcast) reshapes in the 128-aligned case; pad copy only as fallback.
    l_flat = logits.reshape(B, tot_l)
    d_flat = pred_deltas.reshape(B, tot_d)
    if pad_l:
        l_flat = jnp.pad(l_flat, ((0, 0), (0, pad_l)))
    if pad_d:
        d_flat = jnp.pad(d_flat, ((0, 0), (0, pad_d)))
    rows_l = (tot_l + pad_l) // _LANE
    rows_d = (tot_d + pad_d) // _LANE
    l3 = l_flat.reshape(B, rows_l, _LANE)
    d3 = d_flat.reshape(B, rows_d, _LANE)
    assert anchors2d.shape == (rows_d, _LANE), (anchors2d.shape, rows_d)

    row_cap, vmem_limit = _chip_budget()
    g, trd, trl = _pick_tiles(rows_d, rows_l, row_cap, vmem_limit)

    scores3, boxes3 = pl.pallas_call(
        _make_fused_kernel(encode_mean, encode_std),
        out_shape=(jax.ShapeDtypeStruct((B, rows_l, _LANE), jnp.float32),
                   jax.ShapeDtypeStruct((B, rows_d, _LANE), jnp.float32)),
        # Batch innermost + "arbitrary": anchors tile stays resident across the
        # batch loop and any megacore split lands on the row axis.
        grid=(g, B),
        in_specs=[
            pl.BlockSpec((1, trl, _LANE), lambda r, b: (b, r, 0)),   # logits
            pl.BlockSpec((1, trd, _LANE), lambda r, b: (b, r, 0)),   # deltas
            pl.BlockSpec((trd, _LANE), lambda r, b: (r, 0)),         # anchors
        ],
        out_specs=(
            pl.BlockSpec((1, trl, _LANE), lambda r, b: (b, r, 0)),   # scores
            pl.BlockSpec((1, trd, _LANE), lambda r, b: (b, r, 0)),   # boxes
        ),
        compiler_params=pltpu.CompilerParams(
            dimension_semantics=("parallel", "arbitrary"),
            vmem_limit_bytes=vmem_limit),
    )(l3, d3, anchors2d)

    scores = scores3.reshape(B, rows_l * _LANE)
    boxes = boxes3.reshape(B, rows_d * _LANE)
    if pad_l:
        scores = scores[:, :tot_l]
    if pad_d:
        boxes = boxes[:, :tot_d]
    return scores.reshape(B, N, C), boxes.reshape(B, N, 4)


# --------------------------------------------------------------------------
# BBoxPrior forward (inference path, targets=None)
# --------------------------------------------------------------------------
def bbox_prior_forward(predictions, anchors2d, *, num_classes, encode_mean, encode_std):
    B = predictions[0][0].shape[0]
    logits, pred_deltas = [], []
    for score, bbox in predictions:
        # NCHW -> NHWC -> (B, H*W*A, num_classes / 4), matching torch.permute+reshape.
        # XLA fuses these transposes into the concatenate below (~one HBM pass);
        # the kernel then consumes the concatenated buffer via free reshapes.
        logits.append(jnp.transpose(score, (0, 2, 3, 1)).reshape(B, -1, num_classes))
        pred_deltas.append(jnp.transpose(bbox, (0, 2, 3, 1)).reshape(B, -1, 4))
    logits = jnp.concatenate(logits, axis=1)            # (B, N, C)
    pred_deltas = jnp.concatenate(pred_deltas, axis=1)  # (B, N, 4)
    # TODO(synk): consume the raw NCHW head outputs directly in the kernel
    # (per-head strided lane gather) to eliminate the remaining transpose/concat pass.
    return sigmoid_decode_pallas(logits, pred_deltas, anchors2d,
                                 encode_mean=encode_mean, encode_std=encode_std)

# TODO(synk): the training path (match/match_batch IoU assignment + encode + loss)
# is data-dependent scatter/argmax over variable-length targets; not implemented here.


# --------------------------------------------------------------------------
# Pure-JAX reference (for correctness check)
# --------------------------------------------------------------------------
def reference_forward(predictions, *, num_classes, strides, layouts,
                      encode_mean, encode_std):
    B = predictions[0][0].shape[0]
    logits, pred_deltas, fsizes = [], [], []
    for score, bbox in predictions:
        h, w = score.shape[-2], score.shape[-1]
        fsizes.append((w, h))
        logits.append(jnp.transpose(score, (0, 2, 3, 1)).reshape(B, -1, num_classes))
        pred_deltas.append(jnp.transpose(bbox, (0, 2, 3, 1)).reshape(B, -1, 4))
    logits = jnp.concatenate(logits, axis=1)
    pred_deltas = jnp.concatenate(pred_deltas, axis=1)
    anchors = generate_anchors(strides, fsizes, layouts)

    scores = 1.0 / (1.0 + jnp.exp(-logits))
    d = pred_deltas * encode_std + encode_mean
    sizes = jnp.exp(d[..., 2:]) * anchors[..., 2:]
    centers = d[..., :2] * anchors[..., 2:] + anchors[..., :2]
    bboxes = jnp.concatenate([centers - 0.5 * sizes, centers + 0.5 * sizes], axis=-1)
    return scores, bboxes


if __name__ == "__main__":
    key = jax.random.PRNGKey(0)
    B = 2
    num_classes = 2

    anchor_layouts = [
        {"stride": 8,  "scales": [1.0],      "aspects": [1.0, 2.0]},  # A=2, fsize 16x16
        {"stride": 16, "scales": [1.0, 1.5], "aspects": [1.0]},       # A=2, fsize 8x8
    ]
    strides, layouts = generate_base_anchors(anchor_layouts)

    # Static config (baked into the kernel as compile-time constants)
    encode_mean = (0.0, 0.0, 0.0, 0.0)
    encode_std = (0.1, 0.1, 0.2, 0.2)

    # Raw NCHW head outputs (anchors-major channel packing: A*num_classes, A*4)
    k1, k2, k3, k4 = jax.random.split(key, 4)
    preds = [
        (0.5 * jax.random.normal(k1, (B, 2 * num_classes, 16, 16), jnp.float32),
         0.1 * jax.random.normal(k2, (B, 2 * 4, 16, 16), jnp.float32)),
        (0.5 * jax.random.normal(k3, (B, 2 * num_classes, 8, 8), jnp.float32),
         0.1 * jax.random.normal(k4, (B, 2 * 4, 8, 8), jnp.float32)),
    ]

    # Anchors are static for fixed feature sizes: build the padded (rowsD, 128)
    # anchor plane once, outside the jitted forward.
    fsizes = [(p[0].shape[-1], p[0].shape[-2]) for p in preds]
    anchors2d = jax.block_until_ready(prepare_anchor_plane(strides, fsizes, layouts))

    fwd = jax.jit(functools.partial(
        bbox_prior_forward, num_classes=num_classes,
        encode_mean=encode_mean, encode_std=encode_std))

    scores, bboxes = fwd(preds, anchors2d)
    jax.block_until_ready((scores, bboxes))

    ref_scores, ref_bboxes = reference_forward(
        preds, num_classes=num_classes, strides=strides, layouts=layouts,
        encode_mean=jnp.asarray(encode_mean, jnp.float32),
        encode_std=jnp.asarray(encode_std, jnp.float32))

    assert scores.shape == (B, 640, num_classes), scores.shape
    assert bboxes.shape == (B, 640, 4), bboxes.shape
    np.testing.assert_allclose(np.asarray(scores), np.asarray(ref_scores),
                               rtol=1e-5, atol=1e-5)
    np.testing.assert_allclose(np.asarray(bboxes), np.asarray(ref_bboxes),
                               rtol=1e-5, atol=1e-4)

    print("KERNEL_OK")
</pallas_src>

<mosaic_0001>
module attributes {stable_mosaic.version = 11 : i64} {
  func.func @kernel(%arg0: i32, %arg1: i32, %arg2: memref<1x10x128xf32, #tpu.memory_space<vmem>>, %arg3: memref<1x20x128xf32, #tpu.memory_space<vmem>>, %arg4: memref<20x128xf32, #tpu.memory_space<vmem>>, %arg5: memref<1x10x128xf32, #tpu.memory_space<vmem>>, %arg6: memref<1x20x128xf32, #tpu.memory_space<vmem>>) attributes {dimension_semantics = [#tpu.dimension_semantics<parallel>, #tpu.dimension_semantics<arbitrary>], iteration_bounds = array<i64: 1, 2>, scalar_prefetch = 0 : i64, scratch_operands = 0 : i64, tpu.core_type = #tpu.core_type<tc>, window_params = [{transform_indices = @transform_0, window_bounds = array<i64: 1, 10, 128>}, {transform_indices = @transform_1, window_bounds = array<i64: 1, 20, 128>}, {transform_indices = @transform_2, window_bounds = array<i64: 20, 128>}, {transform_indices = @transform_3, window_bounds = array<i64: 1, 10, 128>}, {transform_indices = @transform_4, window_bounds = array<i64: 1, 20, 128>}]} {
    %c0 = arith.constant 0 : index
    %c0_0 = arith.constant 0 : index
    %c0_1 = arith.constant 0 : index
    %0 = vector.load %arg2[%c0, %c0_0, %c0_1] : memref<1x10x128xf32, #tpu.memory_space<vmem>>, vector<1x10x128xf32>
    %1 = vector.shape_cast %0 : vector<1x10x128xf32> to vector<10x128xf32>
    %cst = arith.constant 0.000000e+00 : f32
    %2 = vector.broadcast %cst : f32 to vector<10x128xf32>
    %3 = arith.subf %2, %1 : vector<10x128xf32>
    %4 = math.exp %3 : vector<10x128xf32>
    %cst_2 = arith.constant 1.000000e+00 : f32
    %5 = vector.broadcast %cst_2 : f32 to vector<10x128xf32>
    %6 = arith.addf %5, %4 : vector<10x128xf32>
    %cst_3 = arith.constant 1.000000e+00 : f32
    %7 = vector.broadcast %cst_3 : f32 to vector<10x128xf32>
    %8 = arith.divf %7, %6 : vector<10x128xf32>
    %c0_4 = arith.constant 0 : index
    %c0_5 = arith.constant 0 : index
    %c0_6 = arith.constant 0 : index
    %9 = vector.load %arg5[%c0_4, %c0_5, %c0_6] : memref<1x10x128xf32, #tpu.memory_space<vmem>>, vector<1x10x128xf32>
    %10 = vector.shape_cast %9 : vector<1x10x128xf32> to vector<10x128xf32>
    %11 = vector.shape_cast %8 : vector<10x128xf32> to vector<1x10x128xf32>
    tpu.vector_store %arg5[%c0_4, %c0_5, %c0_6], %11 {strides = array<i32>} : memref<1x10x128xf32, #tpu.memory_space<vmem>>, vector<1x10x128xf32>,
    %c0_7 = arith.constant 0 : index
    %c0_8 = arith.constant 0 : index
    %c0_9 = arith.constant 0 : index
    %12 = vector.load %arg3[%c0_7, %c0_8, %c0_9] : memref<1x20x128xf32, #tpu.memory_space<vmem>>, vector<1x20x128xf32>
    %13 = vector.shape_cast %12 : vector<1x20x128xf32> to vector<20x128xf32>
    %c0_10 = arith.constant 0 : index
    %c0_11 = arith.constant 0 : index
    %14 = vector.load %arg4[%c0_10, %c0_11] : memref<20x128xf32, #tpu.memory_space<vmem>>, vector<20x128xf32>
    %15 = tpu.iota {dimensions = array<i32: 1>} : vector<1x128xi32>
    %c3_i32 = arith.constant 3 : i32
    %16 = vector.broadcast %c3_i32 : i32 to vector<1x128xi32>
    %17 = arith.andi %15, %16 : vector<1x128xi32>
    %c2_i32 = arith.constant 2 : i32
    %18 = vector.broadcast %c2_i32 : i32 to vector<1x128xi32>
    %19 = arith.cmpi slt, %17, %18 : vector<1x128xi32>
    %c2_i32_12 = arith.constant 2 : i32
    %20 = vector.broadcast %c2_i32_12 : i32 to vector<1x128xi32>
    %21 = arith.cmpi slt, %17, %20 : vector<1x128xi32>
    %cst_13 = arith.constant 1.000000e-01 : f32
    %cst_14 = arith.constant 2.000000e-01 : f32
    %22 = vector.broadcast %cst_13 : f32 to vector<1x128xf32>
    %23 = vector.broadcast %cst_14 : f32 to vector<1x128xf32>
    %24 = arith.select %21, %22, %23 : vector<1x128xi1>, vector<1x128xf32>
    %25 = vector.broadcast %24 : vector<1x128xf32> to vector<20x128xf32>
    %26 = arith.mulf %13, %25 : vector<20x128xf32>
    %c126_i32 = arith.constant 126 : i32
    %27 = tpu.dynamic_rotate %14 by %c126_i32 dim 1 : vector<20x128xf32>, i32 -> vector<20x128xf32>
    %28 = arith.mulf %26, %27 : vector<20x128xf32>
    %29 = arith.addf %28, %14 : vector<20x128xf32>
    %30 = math.exp %26 : vector<20x128xf32>
    %31 = arith.mulf %30, %14 : vector<20x128xf32>
    %c126_i32_15 = arith.constant 126 : i32
    %32 = tpu.dynamic_rotate %31 by %c126_i32_15 dim 1 : vector<20x128xf32>, i32 -> vector<20x128xf32>
    %c2_i32_16 = arith.constant 2 : i32
    %33 = tpu.dynamic_rotate %29 by %c2_i32_16 dim 1 : vector<20x128xf32>, i32 -> vector<20x128xf32>
    %cst_17 = arith.constant 5.000000e-01 : f32
    %34 = vector.broadcast %cst_17 : f32 to vector<20x128xf32>
    %35 = arith.mulf %34, %32 : vector<20x128xf32>
    %36 = arith.subf %29, %35 : vector<20x128xf32>
    %cst_18 = arith.constant 5.000000e-01 : f32
    %37 = vector.broadcast %cst_18 : f32 to vector<20x128xf32>
    %38 = arith.mulf %37, %31 : vector<20x128xf32>
    %39 = arith.addf %33, %38 : vector<20x128xf32>
    %40 = vector.shape_cast %19 : vector<1x128xi1> to vector<1x128xi1>
    %41 = vector.broadcast %40 : vector<1x128xi1> to vector<20x128xi1>
    %42 = arith.select %41, %36, %39 : vector<20x128xi1>, vector<20x128xf32>
    %c0_19 = arith.constant 0 : index
    %c0_20 = arith.constant 0 : index
    %c0_21 = arith.constant 0 : index
    %43 = vector.load %arg6[%c0_19, %c0_20, %c0_21] : memref<1x20x128xf32, #tpu.memory_space<vmem>>, vector<1x20x128xf32>
    %44 = vector.shape_cast %43 : vector<1x20x128xf32> to vector<20x128xf32>
    %45 = vector.shape_cast %42 : vector<20x128xf32> to vector<1x20x128xf32>
    tpu.vector_store %arg6[%c0_19, %c0_20, %c0_21], %45 {strides = array<i32>} : memref<1x20x128xf32, #tpu.memory_space<vmem>>, vector<1x20x128xf32>,
    return
  }
  func.func @transform_0(%arg0: i32, %arg1: i32) -> (i32, i32, i32) {
    %c0_i32 = arith.constant 0 : i32
    %c0_i32_0 = arith.constant 0 : i32
    return %arg1, %arg0, %c0_i32 : i32, i32, i32
  }
  func.func @transform_1(%arg0: i32, %arg1: i32) -> (i32, i32, i32) {
    %c0_i32 = arith.constant 0 : i32
    %c0_i32_0 = arith.constant 0 : i32
    return %arg1, %arg0, %c0_i32 : i32, i32, i32
  }
  func.func @transform_2(%arg0: i32, %arg1: i32) -> (i32, i32) {
    %c0_i32 = arith.constant 0 : i32
    %c0_i32_0 = arith.constant 0 : i32
    return %arg0, %c0_i32 : i32, i32
  }
  func.func @transform_3(%arg0: i32, %arg1: i32) -> (i32, i32, i32) {
    %c0_i32 = arith.constant 0 : i32
    %c0_i32_0 = arith.constant 0 : i32
    return %arg1, %arg0, %c0_i32 : i32, i32, i32
  }
  func.func @transform_4(%arg0: i32, %arg1: i32) -> (i32, i32, i32) {
    %c0_i32 = arith.constant 0 : i32
    %c0_i32_0 = arith.constant 0 : i32
    return %arg1, %arg0, %c0_i32 : i32, i32, i32
  }
}

</mosaic_0001>

<bundles_post_ra>
// kernel: bbox_prior_forward.1
= control target key start
LH: loop header
LB: loop body
LE: loop exit
PB: predicated region body
PF: predicated region fallthrough
CT: control target
= control target key end

     0   :  { %s708_s15 = smov 0   ;;  %s710_s16 = smov 0   ;;  %s817_s0 = inlined_call_operand.vmem [shape: f32[2,10,128], index: 0, kind: input, shape index: {}]   ;;  %s818_s1 = inlined_call_operand.vmem [shape: f32[2,20,128], index: 1, kind: input, shape index: {}]   ;;  %s819_s2 = inlined_call_operand.vmem [shape: f32[20,128], index: 2, kind: input, shape index: {}]   ;;  %s820_s3 = inlined_call_operand.vmem [shape: f32[2,10,128], index: 3, kind: output, shape index: {0}]   ;;  %s821_s4 = inlined_call_operand.vmem [shape: f32[2,20,128], index: 4, kind: output, shape index: {1}]  }
   0x1   :  { %s712_s17 = smov 0  }
   0x2 LB: > { %s24_s18 = sadd.s32 1, %s674_s16  ;;  %p603_p0 = scmp.ge.s32.totalorder %s678_s17, 1  ;;  %s678_s17 = sphi %s712_s17, %s15_s17   ;;  %s674_s16 = sphi %s710_s16, %s825_s16   ;;  %s670_s15 = sphi %s708_s15, %s824_s15  }
   0x3   : > { %p25_p1 = scmp.ge.s32.totalorder %s24_s18, 2  ;;  %p216_p2 = scmp.lt.s32.totalorder %s678_s17, 3 }
   0x5   : > { %s827_s18 = smov (%p25_p1, %s24_s18), 0  ;;  %p217_p3 = pnand %p603_p0, %p216_p2 }
   0x6   : > { %p274_p4 = scmp.lt.s32.totalorder (!%p217_p3), %s670_s15, 1  ;;  %s680_s23 = smov (!%p217_p3), 126  }
   0x7   : > { %220 = sbr.rel (%p217_p3) target bundleno = 259 (0x103), region = 32  ;;  %s682_s11 = smov (!%p217_p3), 2  }
   0xc   : > { %v729_v0 = vld [vmem:[%s819_s2 + $0x10] sm:$0xf]  ;;  %v734_v1 = vld [vmem:[%s819_s2] sm:$0xff]  ;;  %v367_v2 = vlaneseq  ;;  %s829_s15 = smov (!%p274_p4, %s670_s15), 1  ;;  %v752_v5 = vld [vmem:[%s819_s2 + $0x8] sm:$0xff] }
   0xd   : > { %379 = vrot.lane.b32.xlu1 %v729_v0, %s680_s23  ;;  %375 = vrot.lane.b32.xlu0 %v734_v1, %s680_s23  ;;  %s614_s24 = smul.u32 24, %s829_s15  ;;  %s612_s25 = sshll.u32 %s829_s15, 4  ;;  %v681_v10 = vmov 0.2  }
   0xe   : > { %v368_v3 = vand.u32 127, %v367_v2  ;;  %s281_s28 = scalar_lea.vmem %s817_s0, %s612_s25  ;;  %s307_s10 = scalar_lea.vmem %s820_s3, %s612_s25 }
   0xf   : > { %s291_s7 = scalar_lea.vmem %s818_s1, %s614_s24  ;;  %v319_v7 = vld [vmem:[%s281_s28] sm:$0xff]  ;;  %v320_v8 = vld [vmem:[%s281_s28 + $0x8] sm:$0x3]  ;;  %s317_s14 = scalar_lea.vmem %s821_s4, %s614_s24 }
  0x10   : > { %v369_v4 = vand.u32 3, %v368_v3  ;;  %v361_v9 = vld [vmem:[%s291_s7] sm:$0xff]  ;;  %v321_v12 = vsub.f32 0.0, %v319_v7  ;;  %v322_v13 = vsub.f32 0.0, %v320_v8  ;;  %v362_v14 = vld [vmem:[%s291_s7 + $0x8] sm:$0xff] }
  0x11   : > { %v363_v17 = vld [vmem:[%s291_s7 + $0x10] sm:$0xf] }
  0x12   : > { %vm759_vm0 = vcmp.lt.s32.totalorder %v369_v4, 2  ;;  %v323_v18 = vmul.f32 1.442695, %v321_v12  ;;  %v325_v19 = vmul.f32 1.442695, %v322_v13 }
  0x13   : > { %v371_v11 = vsel %vm759_vm0, 0.1, %v681_v10 }
  0x14   : > { %v765_v15 = vmul.f32 %v371_v11, %v361_v9  ;;  %v767_v16 = vmul.f32 %v371_v11, %v362_v14  ;;  %v374_v22 = vmul.f32 %v371_v11, %v363_v17  ;;  %642 = vpow2.f32 %v323_v18 }
  0x15   : > { %377 = vrot.lane.b32.xlu0 %v752_v5, %s680_s23 }
  0x16   : > { %v387_v20 = vmul.f32 1.442695, %v765_v15  ;;  %v389_v21 = vmul.f32 1.442695, %v767_v16  ;;  %v391_v23 = vmul.f32 1.442695, %v374_v22 }
  0x18   : > { %644 = vpow2.f32 %v387_v20 }
  0x19   : > { %646 = vpow2.f32 %v325_v19 }
  0x1a   : > { %648 = vpow2.f32 %v389_v21  ;;  %v643_v24 = vpop.eup %642 }
  0x1b   : > { %v327_v26 = vadd.f32 1.0, %v643_v24  ;;  %650 = vpow2.f32 %v391_v23 }
  0x1d   : > { %652 = vrcp.f32 %v327_v26  ;;  %vm334_vm1 = vweird.f32 %v327_v26  ;;  %v340_v37 = vand.u32 2147483648, %v327_v26  ;;  %v338_v39 = vand.u32 2147483647, %v327_v26 }
  0x1e   : > { %v645_v25 = vpop.eup %644 }
  0x1f   : > { %v647_v27 = vpop.eup %646  ;;  %v774_v28 = vmul.f32 %v645_v25, %v734_v1  ;;  %v341_v45 = vor.u32 1.1754944e-38, %v340_v37  ;;  %vm339_vm6 = vcmp.eq.f32.partialorder %v338_v39, 8.507059e+37 }
  0x20   : > { %v649_v29 = vpop.eup %648  ;;  %v328_v30 = vadd.f32 1.0, %v647_v27 }
  0x21   : > { %396 = vrot.lane.b32.xlu1 %v774_v28, %s680_s23  ;;  %v779_v31 = vmul.f32 %v649_v29, %v752_v5  ;;  %v651_v32 = vpop.eup %650 }
  0x22   : > { %654 = vrcp.f32 %v328_v30  ;;  %v395_v35 = vmul.f32 %v651_v32, %v729_v0  ;;  %vm349_vm3 = vweird.f32 %v328_v30  ;;  %v355_v41 = vand.u32 2147483648, %v328_v30 }
  0x23   : > { %398 = vrot.lane.b32.xlu2 %v779_v31, %s680_s23  ;;  %v653_v33 = vpop.eup %652  ;;  %v353_v44 = vand.u32 2147483647, %v328_v30 }
  0x24   : > { %v330_v34 = vmul.f32 %v653_v33, %v327_v26  ;;  %vm335_vm2 = vweird.f32 %v653_v33  ;;  %v356_v48 = vor.u32 1.1754944e-38, %v355_v41  ;;  %v416_v4 = vmul.f32 0.5, %v395_v35 }
  0x25   : > { %vm336_vm5 = vmor %vm334_vm1, %vm335_vm2  ;;  %vm354_vm8 = vcmp.eq.f32.partialorder %v353_v44, 8.507059e+37 }
  0x26   : > { %v331_v38 = vsub.f32 1.0, %v330_v34 }
  0x28   : > { %v655_v36 = vpop.eup %654  ;;  %v332_v42 = vmul.f32 %v653_v33, %v331_v38 }
  0x29   : > { %v345_v40 = vmul.f32 %v655_v36, %v328_v30  ;;  %vm350_vm4 = vweird.f32 %v655_v36 }
  0x2a   : > { %v333_v46 = vadd.f32 %v653_v33, %v332_v42  ;;  %vm351_vm7 = vmor %vm349_vm3, %vm350_vm4 }
  0x2b   : > { %v346_v43 = vsub.f32 1.0, %v345_v40  ;;  %400 = vrot.lane.b32.xlu2 %v395_v35, %s680_s23 }
  0x2c   : > { %v337_v49 = vsel %vm336_vm5, %v653_v33, %v333_v46 }
  0x2d   : > { %v347_v47 = vmul.f32 %v655_v36, %v346_v43  ;;  %v342_v51 = vsel %vm339_vm6, %v341_v45, %v337_v49 }
  0x2e   : > { %359 = vst [vmem:[%s307_s10] sm:$0xff] %v342_v51 }
  0x2f   : > { %v348_v50 = vadd.f32 %v655_v36, %v347_v47 }
  0x31   : > { %v352_v52 = vsel %vm351_vm7, %v655_v36, %v348_v50 }
  0x32   : > { %v357_v53 = vsel %vm354_vm8, %v356_v48, %v352_v52 }
  0x33   : > { %360 = vst [vmem:[%s307_s10 + $0x8] sm:$0x3] %v357_v53 }
  0x7d   : > { %v399_v63 = vpop.permute.xlu2 %398 }
  0x7f   : > { %v380_v54 = vpop.permute.xlu1 %379  ;;  %v376_v55 = vpop.permute.xlu0 %375 }
  0x80   : > { %v383_v56 = vmul.f32 %v380_v54, %v374_v22  ;;  %v381_v57 = vmul.f32 %v376_v55, %v765_v15  ;;  %v409_v15 = vmul.f32 0.5, %v399_v63 }
  0x82   : > { %v386_v58 = vadd.f32 %v383_v56, %v729_v0  ;;  %v384_v59 = vadd.f32 %v381_v57, %v734_v1 }
  0x84   : > { %406 = vrot.lane.b32.xlu2 %v386_v58, %s682_s11  ;;  %402 = vrot.lane.b32.xlu0 %v384_v59, %s682_s11 }
  0x85   : > { %v401_v2 = vpop.permute.xlu2 %400 }
  0x86   : > { %v410_v3 = vmul.f32 0.5, %v401_v2 }
  0x87   : > { %v378_v60 = vpop.permute.xlu0 %377 }
  0x88   : > { %v382_v61 = vmul.f32 %v378_v60, %v767_v16  ;;  %v413_v8 = vsub.f32 %v386_v58, %v410_v3  ;;  %v415_v16 = vmul.f32 0.5, %v779_v31 }
  0x8a   : > { %v385_v62 = vadd.f32 %v382_v61, %v752_v5  ;;  %v414_v5 = vmul.f32 0.5, %v774_v28 }
  0x8c   : > { %404 = vrot.lane.b32.xlu1 %v385_v62, %s682_s11  ;;  %v412_v18 = vsub.f32 %v385_v62, %v409_v15 }
  0x93   : > { %v397_v9 = vpop.permute.xlu1 %396 }
  0x94   : > { %v408_v10 = vmul.f32 0.5, %v397_v9 }
  0x96   : > { %v411_v12 = vsub.f32 %v384_v59, %v408_v10 }
  0xde   : > { %v407_v7 = vpop.permute.xlu2 %406 }
  0xdf   : > { %v419_v0 = vadd.f32 %v416_v4, %v407_v7 }
  0xe1   : > { %v424_v1 = vsel %vm759_vm0, %v413_v8, %v419_v0 }
  0xe2   : > { %427 = vst [vmem:[%s317_s14 + $0x10] sm:$0xf] %v424_v1 }
  0xf6   : > { %v403_v11 = vpop.permute.xlu0 %402 }
  0xf7   : > { %v417_v13 = vadd.f32 %v414_v5, %v403_v11 }
  0xf9   : > { %v422_v14 = vsel %vm759_vm0, %v411_v12, %v417_v13 }
  0xfa   : > { %425 = vst [vmem:[%s317_s14] sm:$0xff] %v422_v14 }
  0xfe   : > { %v405_v17 = vpop.permute.xlu1 %404 }
  0xff   : > { %v418_v19 = vadd.f32 %v415_v16, %v405_v17 }
 0x101   : > { %v423_v20 = vsel %vm759_vm0, %v412_v18, %v418_v19 }
 0x102   : > { %426 = vst [vmem:[%s317_s14 + $0x8] sm:$0xff] %v423_v20 }
 0x103 PF: > { %s15_s17 = sadd.s32 1, %s678_s17   ;;  %s824_s15 = smov %s674_s16 }
 0x104   : > { %p12_p5 = scmp.ge.s32.totalorder %s15_s17, 4   ;;  %s825_s16 = smov %s827_s18 }
 0x106   :  { %14 = sbr.rel (!%p12_p5) target bundleno = 2 (0x2), region = 80 }

</bundles_post_ra>
